<compile_context>
chip_gen: v7x
topology: tpu7x:2x2x1
jax: 0.10.0
libtpu: 0.0.40
codegen_flags: <defaults>
</compile_context>

<pallas_src>
import functools

import jax
import jax.numpy as jnp
from jax.experimental import pallas as pl
from jax.experimental.pallas import tpu as pltpu

EPS = 1e-5  # PyTorch BatchNorm1d default eps


# ----------------------------------------------------------------------------
# Fused Pallas kernel: the entire DecoderConvLayer forward
# ----------------------------------------------------------------------------
def _decoder_layer_kernel(xs_ref, re_ref, ro_ref,          # activations
                          s1_ref, t1_ref, s2_ref, t2_ref,  # folded BN params
                          wTU_ref,                         # block-diag convT weights
                          w2_ref, b2_ref,                  # conv1d_2 (K folded) + bias
                          o_ref, *, seg_len):
    """All operands are 2-D with batch folded into the lane (last) dim.

    xs  : (Cin,  B*L)    raw x, layout x[b, c, l] -> xs[c, b*L + l]
    re  : (Cout, B*L)    r at even time positions (r[..., 2l])
    ro  : (Cout, B*L)    r at odd  time positions (r[..., 2l+1])
    wTU : (4*Cout, 2*Cin) block-diag [ [convT1 taps, 0], [0, upsample taps] ]
    w2  : (Cout, 6*Cout)  the 3 conv taps folded into the contraction dim
    o   : (Cout, 2*B*L)   [even columns | odd columns] of the final output
    """
    L = seg_len
    cout = b2_ref.shape[0]
    xs = xs_ref[...]

    # ---- bn1 (eval, folded) + ReLU ------------------------------------------
    h1 = jnp.maximum(xs * s1_ref[...] + t1_ref[...], 0.0)            # (Cin, BL)

    # ---- convT1(k=2,s=2) + upsample(k=2,s=2) in ONE MXU contraction ----------
    # Block-diagonal weight applied to the row-stacked inputs [h1 ; xs]:
    #   rows 0:Cout    -> convT1 even columns (tap 0 on h1)
    #   rows Cout:2C   -> convT1 odd  columns (tap 1 on h1)
    #   rows 2C:3C     -> upsample even columns (tap 0 on xs)
    #   rows 3C:4C     -> upsample odd  columns (tap 1 on xs)
    hx = jnp.concatenate([h1, xs], axis=0)                            # (2Cin, BL)
    y = jnp.dot(wTU_ref[...], hx, preferred_element_type=jnp.float32)  # (4Cout, BL)
    oe = y[:cout, :]              # convT1 bias folded into t2
    oo = y[cout:2 * cout, :]
    ue = y[2 * cout:3 * cout, :]  # upsample bias folded into b2
    uo = y[3 * cout:, :]

    # ---- cat([convT1_out, r], channel) -> bn2 (folded) + ReLU, per parity ----
    s2 = s2_ref[...]
    t2 = t2_ref[...]
    h2e = jnp.maximum(jnp.concatenate([oe, re_ref[...]], axis=0) * s2 + t2, 0.0)
    h2o = jnp.maximum(jnp.concatenate([oo, ro_ref[...]], axis=0) * s2 + t2, 0.0)

    # ---- zero-padded neighbour columns for the k=3, pad=1 conv ---------------
    # Per-batch segments of length L live side by side along the lane dim, so
    # the rolled value at each segment boundary is masked back to the conv's
    # zero padding.
    n = h2e.shape[1]
    col = jax.lax.broadcasted_iota(jnp.int32, h2e.shape, dimension=1)
    h2o_m1 = jnp.where(col % L == 0, 0.0, pltpu.roll(h2o, shift=1, axis=1))
    h2e_p1 = jnp.where(col % L == L - 1, 0.0, pltpu.roll(h2e, shift=n - 1, axis=1))

    # ---- conv1d_2: fold the 3 taps into the contraction dim ------------------
    #   out[:, 2l]   = W0 @ h2[:, 2l-1] + W1 @ h2[:, 2l]   + W2 @ h2[:, 2l+1]
    #   out[:, 2l+1] = W0 @ h2[:, 2l]   + W1 @ h2[:, 2l+1] + W2 @ h2[:, 2l+2]
    # Even/odd output columns share the weights, so they are fused along lanes
    # into one (Cout, 2*B*L) MXU contraction.
    se = jnp.concatenate([h2o_m1, h2e, h2o], axis=0)                  # (6Cout, BL)
    so = jnp.concatenate([h2e, h2o, h2e_p1], axis=0)                  # (6Cout, BL)
    big = jnp.concatenate([se, so], axis=1)                           # (6Cout, 2BL)

    # ---- final: upsample(x) + conv1d_2(...)  (dropouts are identity) ---------
    up = jnp.concatenate([ue, uo], axis=1)                            # (Cout, 2BL)
    o_ref[...] = (jnp.dot(w2_ref[...], big, preferred_element_type=jnp.float32)
                  + b2_ref[...] + up)


# ----------------------------------------------------------------------------
# Wrapper: layout plumbing (batch -> lanes, even/odd split) + one pallas_call
# ----------------------------------------------------------------------------
@jax.jit
def decoder_conv_layer(x, r, params):
    """x: (B, dim_in, L), r: (B, dim_out, 2L) -> (B, dim_out, 2L)."""
    B, cin, L = x.shape
    cout = params["b2"].shape[0]

    # Fold batch into the lane dim; de-interleave r into even/odd columns.
    xs = jnp.transpose(x, (1, 0, 2)).reshape(cin, B * L)
    r4 = r.reshape(B, cout, L, 2)
    re = jnp.transpose(r4[..., 0], (1, 0, 2)).reshape(cout, B * L)
    ro = jnp.transpose(r4[..., 1], (1, 0, 2)).reshape(cout, B * L)

    out = pl.pallas_call(
        functools.partial(_decoder_layer_kernel, seg_len=L),
        out_shape=jax.ShapeDtypeStruct((cout, 2 * B * L), jnp.float32),
    )(xs, re, ro,
      params["s1"], params["t1"], params["s2"], params["t2"],
      params["wTU"], params["w2cat"], params["b2"])

    # (Cout, 2*B*L) -> (B, Cout, 2L):  out[c, p*BL + b*L + l] == y[b, c, 2l + p]
    out = out.reshape(cout, 2, B, L)
    out = jnp.transpose(out, (2, 0, 3, 1)).reshape(B, cout, 2 * L)
    return out


# ----------------------------------------------------------------------------
# Parameters: raw (PyTorch-layout) init + one-time prep (BN fold, weight packs)
# ----------------------------------------------------------------------------
def _u(key, shape, lo=-0.1, hi=0.1):
    return jax.random.uniform(key, shape, jnp.float32, lo, hi)


def init_raw_params(key, dim_in, dim_out):
    ks = iter(jax.random.split(key, 14))
    return {
        # ConvTranspose1d weights: (in_channels, out_channels, k)
        "convT1_w": _u(next(ks), (dim_in, dim_out, 2)),
        "convT1_b": _u(next(ks), (dim_out,)),
        "up_w": _u(next(ks), (dim_in, dim_out, 2)),
        "up_b": _u(next(ks), (dim_out,)),
        # Conv1d weight: (out_channels, in_channels, k)
        "conv2_w": _u(next(ks), (dim_out, 2 * dim_out, 3)),
        "conv2_b": _u(next(ks), (dim_out,)),
        # BatchNorm1d (gamma, beta, running_mean, running_var)
        "norm1": (_u(next(ks), (dim_in,), 0.5, 1.5), _u(next(ks), (dim_in,)),
                  _u(next(ks), (dim_in,)), _u(next(ks), (dim_in,), 0.5, 1.5)),
        "norm2": (_u(next(ks), (2 * dim_out,), 0.5, 1.5), _u(next(ks), (2 * dim_out,)),
                  _u(next(ks), (2 * dim_out,)), _u(next(ks), (2 * dim_out,), 0.5, 1.5)),
    }


def prepare_params(raw):
    """One-time: fold eval-mode BN + conv biases, pack/block-diag conv weights."""
    g1, b1, m1, v1 = raw["norm1"]
    g2, b2n, m2, v2 = raw["norm2"]
    s1 = g1 * jax.lax.rsqrt(v1 + EPS)
    t1 = b1 - m1 * s1
    s2 = g2 * jax.lax.rsqrt(v2 + EPS)
    t2 = b2n - m2 * s2

    wT, wU, w2 = raw["convT1_w"], raw["up_w"], raw["conv2_w"]
    cin, cout = wT.shape[0], wT.shape[1]

    # Both k-taps stacked on rows: rows [0:Cout] = tap0 (even), [Cout:2Cout] = tap1 (odd)
    wT01 = jnp.concatenate([wT[:, :, 0].T, wT[:, :, 1].T], axis=0)     # (2Cout, Cin)
    wU01 = jnp.concatenate([wU[:, :, 0].T, wU[:, :, 1].T], axis=0)     # (2Cout, Cin)
    z = jnp.zeros((2 * cout, cin), jnp.float32)
    wTU = jnp.concatenate(
        [jnp.concatenate([wT01, z], axis=1),
         jnp.concatenate([z, wU01], axis=1)], axis=0)                  # (4Cout, 2Cin)

    # Fold the convT1 bias into the BN2 shift (only the first Cout channels of
    # the cat see it), and the upsample bias into the conv2 bias.
    t2f = t2.at[:cout].add(s2[:cout] * raw["convT1_b"])
    b2f = raw["conv2_b"] + raw["up_b"]

    return {
        "s1": s1.reshape(-1, 1), "t1": t1.reshape(-1, 1),
        "s2": s2.reshape(-1, 1), "t2": t2f.reshape(-1, 1),
        "wTU": wTU,
        # 3 conv taps folded into the contraction dim: (Cout, 3*2Cout)
        "w2cat": jnp.concatenate([w2[:, :, 0], w2[:, :, 1], w2[:, :, 2]], axis=1),
        "b2": b2f.reshape(cout, 1),
    }


# ----------------------------------------------------------------------------
# Pure-JAX reference (PyTorch semantics) for a correctness check
# ----------------------------------------------------------------------------
def ref_forward(x, r, raw):
    def bn_eval(h, g, b, m, v):
        s = g * jax.lax.rsqrt(v + EPS)
        return (h - m[None, :, None]) * s[None, :, None] + b[None, :, None]

    def conv_transpose_k2s2(h, w, b):
        y = jnp.einsum('bil,iok->bolk', h, w)       # (B, Cout, L, 2)
        B_, co, L_, _ = y.shape
        return y.reshape(B_, co, 2 * L_) + b[None, :, None]

    h1 = jnp.maximum(bn_eval(x, *raw["norm1"]), 0.0)
    out = conv_transpose_k2s2(h1, raw["convT1_w"], raw["convT1_b"])
    out = jnp.concatenate([out, r], axis=1)
    h2 = jnp.maximum(bn_eval(out, *raw["norm2"]), 0.0)
    hp = jnp.pad(h2, ((0, 0), (0, 0), (1, 1)))
    Lout = h2.shape[-1]
    out2 = sum(jnp.einsum('bdl,cd->bcl', hp[:, :, k:k + Lout], raw["conv2_w"][:, :, k])
               for k in range(3)) + raw["conv2_b"][None, :, None]
    up = conv_transpose_k2s2(x, raw["up_w"], raw["up_b"])
    return up + out2


# ----------------------------------------------------------------------------
if __name__ == "__main__":
    # Small shapes consistent with DecoderConvLayer(dim_in, dim_out):
    # x: (B, dim_in, L), r: (B, dim_out, 2L).  B*L = 128 -> lane-dense stores.
    B, dim_in, dim_out, L = 2, 16, 16, 64

    key = jax.random.PRNGKey(0)
    k_p, k_x, k_r = jax.random.split(key, 3)
    raw = init_raw_params(k_p, dim_in, dim_out)
    params = prepare_params(raw)

    x = jax.random.normal(k_x, (B, dim_in, L), jnp.float32)
    r = jax.random.normal(k_r, (B, dim_out, 2 * L), jnp.float32)

    out = decoder_conv_layer(x, r, params)
    out = jax.block_until_ready(out)

    assert out.shape == (B, dim_out, 2 * L), out.shape
    assert bool(jnp.all(jnp.isfinite(out)))

    ref = jax.block_until_ready(ref_forward(x, r, raw))
    max_err = float(jnp.max(jnp.abs(out - ref)))
    assert bool(jnp.allclose(out, ref, atol=1e-3, rtol=1e-3)), max_err

    print("KERNEL_OK")
</pallas_src>

<mosaic_0001>
module attributes {stable_mosaic.version = 11 : i64} {
  func.func @_decoder_layer_kernel(%arg0: memref<16x128xf32, #tpu.memory_space<vmem>>, %arg1: memref<16x128xf32, #tpu.memory_space<vmem>>, %arg2: memref<16x128xf32, #tpu.memory_space<vmem>>, %arg3: memref<16x1xf32, #tpu.memory_space<vmem>>, %arg4: memref<16x1xf32, #tpu.memory_space<vmem>>, %arg5: memref<32x1xf32, #tpu.memory_space<vmem>>, %arg6: memref<32x1xf32, #tpu.memory_space<vmem>>, %arg7: memref<64x32xf32, #tpu.memory_space<vmem>>, %arg8: memref<16x96xf32, #tpu.memory_space<vmem>>, %arg9: memref<16x1xf32, #tpu.memory_space<vmem>>, %arg10: memref<16x256xf32, #tpu.memory_space<vmem>>) attributes {dimension_semantics = [], scalar_prefetch = 0 : i64, scratch_operands = 0 : i64, tpu.core_type = #tpu.core_type<tc>} {
    %c0 = arith.constant 0 : index
    %c0_0 = arith.constant 0 : index
    %0 = vector.load %arg0[%c0, %c0_0] : memref<16x128xf32, #tpu.memory_space<vmem>>, vector<16x128xf32>
    %c0_1 = arith.constant 0 : index
    %c0_2 = arith.constant 0 : index
    %1 = vector.load %arg3[%c0_1, %c0_2] : memref<16x1xf32, #tpu.memory_space<vmem>>, vector<16x1xf32>
    %2 = vector.broadcast %1 : vector<16x1xf32> to vector<16x128xf32>
    %3 = arith.mulf %0, %2 : vector<16x128xf32>
    %c0_3 = arith.constant 0 : index
    %c0_4 = arith.constant 0 : index
    %4 = vector.load %arg4[%c0_3, %c0_4] : memref<16x1xf32, #tpu.memory_space<vmem>>, vector<16x1xf32>
    %5 = vector.broadcast %4 : vector<16x1xf32> to vector<16x128xf32>
    %6 = arith.addf %3, %5 : vector<16x128xf32>
    %cst = arith.constant 0.000000e+00 : f32
    %7 = vector.broadcast %cst : f32 to vector<16x128xf32>
    %8 = arith.maximumf %6, %7 : vector<16x128xf32>
    %9 = tpu.concatenate %8, %0 in 0 : vector<16x128xf32>, vector<16x128xf32> -> vector<32x128xf32>
    %c0_5 = arith.constant 0 : index
    %c0_6 = arith.constant 0 : index
    %10 = vector.load %arg7[%c0_5, %c0_6] : memref<64x32xf32, #tpu.memory_space<vmem>>, vector<64x32xf32>
    %cst_7 = arith.constant dense<0.000000e+00> : vector<64x128xf32>
    %11 = tpu.matmul %10, %9, %cst_7 {dimension_numbers = #tpu.dot_dimension_numbers<[1], [0], [0], [1], [0, 0, 1, 1], [], []>} : vector<64x32xf32>, vector<32x128xf32>, vector<64x128xf32> -> vector<64x128xf32>
    %12 = vector.extract_strided_slice %11 {offsets = [0, 0], sizes = [16, 128], strides = [1, 1]} : vector<64x128xf32> to vector<16x128xf32>
    %13 = vector.extract_strided_slice %11 {offsets = [16, 0], sizes = [16, 128], strides = [1, 1]} : vector<64x128xf32> to vector<16x128xf32>
    %14 = vector.extract_strided_slice %11 {offsets = [32, 0], sizes = [16, 128], strides = [1, 1]} : vector<64x128xf32> to vector<16x128xf32>
    %15 = vector.extract_strided_slice %11 {offsets = [48, 0], sizes = [16, 128], strides = [1, 1]} : vector<64x128xf32> to vector<16x128xf32>
    %c0_8 = arith.constant 0 : index
    %c0_9 = arith.constant 0 : index
    %16 = vector.load %arg5[%c0_8, %c0_9] : memref<32x1xf32, #tpu.memory_space<vmem>>, vector<32x1xf32>
    %c0_10 = arith.constant 0 : index
    %c0_11 = arith.constant 0 : index
    %17 = vector.load %arg6[%c0_10, %c0_11] : memref<32x1xf32, #tpu.memory_space<vmem>>, vector<32x1xf32>
    %c0_12 = arith.constant 0 : index
    %c0_13 = arith.constant 0 : index
    %18 = vector.load %arg1[%c0_12, %c0_13] : memref<16x128xf32, #tpu.memory_space<vmem>>, vector<16x128xf32>
    %19 = tpu.concatenate %12, %18 in 0 : vector<16x128xf32>, vector<16x128xf32> -> vector<32x128xf32>
    %20 = vector.broadcast %16 : vector<32x1xf32> to vector<32x128xf32>
    %21 = arith.mulf %19, %20 : vector<32x128xf32>
    %22 = vector.broadcast %17 : vector<32x1xf32> to vector<32x128xf32>
    %23 = arith.addf %21, %22 : vector<32x128xf32>
    %cst_14 = arith.constant 0.000000e+00 : f32
    %24 = vector.broadcast %cst_14 : f32 to vector<32x128xf32>
    %25 = arith.maximumf %23, %24 : vector<32x128xf32>
    %c0_15 = arith.constant 0 : index
    %c0_16 = arith.constant 0 : index
    %26 = vector.load %arg2[%c0_15, %c0_16] : memref<16x128xf32, #tpu.memory_space<vmem>>, vector<16x128xf32>
    %27 = tpu.concatenate %13, %26 in 0 : vector<16x128xf32>, vector<16x128xf32> -> vector<32x128xf32>
    %28 = vector.broadcast %16 : vector<32x1xf32> to vector<32x128xf32>
    %29 = arith.mulf %27, %28 : vector<32x128xf32>
    %30 = vector.broadcast %17 : vector<32x1xf32> to vector<32x128xf32>
    %31 = arith.addf %29, %30 : vector<32x128xf32>
    %cst_17 = arith.constant 0.000000e+00 : f32
    %32 = vector.broadcast %cst_17 : f32 to vector<32x128xf32>
    %33 = arith.maximumf %31, %32 : vector<32x128xf32>
    %34 = tpu.iota {dimensions = array<i32: 1>} : vector<32x128xi32>
    %c64_i32 = arith.constant 64 : i32
    %c0_i32 = arith.constant 0 : i32
    %35 = arith.cmpi eq, %c64_i32, %c0_i32 : i32
    %c1_i32 = arith.constant 1 : i32
    %36 = arith.select %35, %c1_i32, %c64_i32 : i32
    %37 = vector.broadcast %36 : i32 to vector<32x128xi32>
    %38 = arith.remsi %34, %37 : vector<32x128xi32>
    %c0_i32_18 = arith.constant 0 : i32
    %39 = vector.broadcast %c0_i32_18 : i32 to vector<32x128xi32>
    %40 = arith.cmpi ne, %38, %39 : vector<32x128xi32>
    %c0_i32_19 = arith.constant 0 : i32
    %41 = vector.broadcast %c0_i32_19 : i32 to vector<32x128xi32>
    %42 = arith.cmpi slt, %38, %41 : vector<32x128xi32>
    %c0_i32_20 = arith.constant 0 : i32
    %43 = arith.cmpi slt, %36, %c0_i32_20 : i32
    %44 = vector.broadcast %43 : i1 to vector<32x128xi1>
    %45 = vector.broadcast %44 : vector<32x128xi1> to vector<32x128xi1>
    %46 = arith.xori %42, %45 : vector<32x128xi1>
    %47 = arith.andi %46, %40 : vector<32x128xi1>
    %48 = vector.broadcast %36 : i32 to vector<32x128xi32>
    %49 = arith.addi %38, %48 : vector<32x128xi32>
    %50 = arith.select %47, %49, %38 : vector<32x128xi1>, vector<32x128xi32>
    %c0_i32_21 = arith.constant 0 : i32
    %51 = vector.broadcast %c0_i32_21 : i32 to vector<32x128xi32>
    %52 = arith.cmpi eq, %50, %51 : vector<32x128xi32>
    %c1_i32_22 = arith.constant 1 : i32
    %53 = tpu.dynamic_rotate %33 by %c1_i32_22 dim 1 : vector<32x128xf32>, i32 -> vector<32x128xf32>
    %cst_23 = arith.constant 0.000000e+00 : f32
    %54 = vector.broadcast %cst_23 : f32 to vector<32x128xf32>
    %55 = arith.select %52, %54, %53 : vector<32x128xi1>, vector<32x128xf32>
    %c64_i32_24 = arith.constant 64 : i32
    %c0_i32_25 = arith.constant 0 : i32
    %56 = arith.cmpi eq, %c64_i32_24, %c0_i32_25 : i32
    %c1_i32_26 = arith.constant 1 : i32
    %57 = arith.select %56, %c1_i32_26, %c64_i32_24 : i32
    %58 = vector.broadcast %57 : i32 to vector<32x128xi32>
    %59 = arith.remsi %34, %58 : vector<32x128xi32>
    %c0_i32_27 = arith.constant 0 : i32
    %60 = vector.broadcast %c0_i32_27 : i32 to vector<32x128xi32>
    %61 = arith.cmpi ne, %59, %60 : vector<32x128xi32>
    %c0_i32_28 = arith.constant 0 : i32
    %62 = vector.broadcast %c0_i32_28 : i32 to vector<32x128xi32>
    %63 = arith.cmpi slt, %59, %62 : vector<32x128xi32>
    %c0_i32_29 = arith.constant 0 : i32
    %64 = arith.cmpi slt, %57, %c0_i32_29 : i32
    %65 = vector.broadcast %64 : i1 to vector<32x128xi1>
    %66 = vector.broadcast %65 : vector<32x128xi1> to vector<32x128xi1>
    %67 = arith.xori %63, %66 : vector<32x128xi1>
    %68 = arith.andi %67, %61 : vector<32x128xi1>
    %69 = vector.broadcast %57 : i32 to vector<32x128xi32>
    %70 = arith.addi %59, %69 : vector<32x128xi32>
    %71 = arith.select %68, %70, %59 : vector<32x128xi1>, vector<32x128xi32>
    %c63_i32 = arith.constant 63 : i32
    %72 = vector.broadcast %c63_i32 : i32 to vector<32x128xi32>
    %73 = arith.cmpi eq, %71, %72 : vector<32x128xi32>
    %c127_i32 = arith.constant 127 : i32
    %74 = tpu.dynamic_rotate %25 by %c127_i32 dim 1 : vector<32x128xf32>, i32 -> vector<32x128xf32>
    %cst_30 = arith.constant 0.000000e+00 : f32
    %75 = vector.broadcast %cst_30 : f32 to vector<32x128xf32>
    %76 = arith.select %73, %75, %74 : vector<32x128xi1>, vector<32x128xf32>
    %77 = tpu.concatenate %55, %25, %33 in 0 : vector<32x128xf32>, vector<32x128xf32>, vector<32x128xf32> -> vector<96x128xf32>
    %78 = tpu.concatenate %25, %33, %76 in 0 : vector<32x128xf32>, vector<32x128xf32>, vector<32x128xf32> -> vector<96x128xf32>
    %79 = tpu.concatenate %77, %78 in 1 : vector<96x128xf32>, vector<96x128xf32> -> vector<96x256xf32>
    %80 = tpu.concatenate %14, %15 in 1 : vector<16x128xf32>, vector<16x128xf32> -> vector<16x256xf32>
    %c0_31 = arith.constant 0 : index
    %c0_32 = arith.constant 0 : index
    %81 = vector.load %arg8[%c0_31, %c0_32] : memref<16x96xf32, #tpu.memory_space<vmem>>, vector<16x96xf32>
    %cst_33 = arith.constant dense<0.000000e+00> : vector<16x256xf32>
    %82 = tpu.matmul %81, %79, %cst_33 {dimension_numbers = #tpu.dot_dimension_numbers<[1], [0], [0], [1], [0, 0, 1, 1], [], []>} : vector<16x96xf32>, vector<96x256xf32>, vector<16x256xf32> -> vector<16x256xf32>
    %c0_34 = arith.constant 0 : index
    %c0_35 = arith.constant 0 : index
    %83 = vector.load %arg9[%c0_34, %c0_35] : memref<16x1xf32, #tpu.memory_space<vmem>>, vector<16x1xf32>
    %84 = vector.broadcast %83 : vector<16x1xf32> to vector<16x256xf32>
    %85 = arith.addf %82, %84 : vector<16x256xf32>
    %86 = arith.addf %85, %80 : vector<16x256xf32>
    %c0_36 = arith.constant 0 : index
    %c0_37 = arith.constant 0 : index
    %87 = vector.load %arg10[%c0_36, %c0_37] : memref<16x256xf32, #tpu.memory_space<vmem>>, vector<16x256xf32>
    tpu.vector_store %arg10[%c0_36, %c0_37], %86 {strides = array<i32>} : memref<16x256xf32, #tpu.memory_space<vmem>>, vector<16x256xf32>,
    return
  }
}

</mosaic_0001>

<bundles_post_ra>
// kernel: decoder_conv_layer.1
= control target key start
LH: loop header
LB: loop body
LE: loop exit
PB: predicated region body
PF: predicated region fallthrough
CT: control target
= control target key end

     0   :  { %v553_v0 = vmov 0   ;;  %vm75_vm0 = vcmask 261120   ;;  %s554_s28 = smov 1   ;;  %s555_s29 = smov 127   ;;  %vm335_vm5 = vcmask 785408   ;;  %s730_s4 = inlined_call_operand.vmem [shape: f32[16,1], index: 4, kind: input, shape index: {}]   ;;  %s731_s3 = inlined_call_operand.vmem [shape: f32[16,1], index: 3, kind: input, shape index: {}]   ;;  %s732_s5 = inlined_call_operand.vmem [shape: f32[32,1], index: 5, kind: input, shape index: {}]   ;;  %s733_s6 = inlined_call_operand.vmem [shape: f32[32,1], index: 6, kind: input, shape index: {}]   ;;  %s734_s7 = inlined_call_operand.vmem [shape: f32[64,32], index: 7, kind: input, shape index: {}]   ;;  %s735_s0 = inlined_call_operand.vmem [shape: f32[16,128], index: 0, kind: input, shape index: {}]   ;;  %s736_s1 = inlined_call_operand.vmem [shape: f32[16,128], index: 1, kind: input, shape index: {}]   ;;  %s737_s2 = inlined_call_operand.vmem [shape: f32[16,128], index: 2, kind: input, shape index: {}]   ;;  %s738_s9 = inlined_call_operand.vmem [shape: f32[16,1], index: 9, kind: input, shape index: {}]   ;;  %s739_s8 = inlined_call_operand.vmem [shape: f32[16,96], index: 8, kind: input, shape index: {}]   ;;  %s740_s10 = inlined_call_operand.vmem [shape: f32[16,256], index: 10, kind: output, shape index: {}]  }
   0x1   :  { %532 = vset.pattern.permute.xlu1 %v553_v0  ;;  %531 = vset.pattern.permute.xlu0 %v553_v0  ;;  %v51_v1 = vld [vmem:[%s730_s4] sm:$0xff]  ;;  %v52_v3 = vld [vmem:[%s730_s4 + $0x8] sm:$0xff]  ;;  %v208_v9 = vld [vmem:[%s732_s5 + $0x18] sm:$0xff] }
   0x2   :  { %v37_v2 = vld [vmem:[%s731_s3] sm:$0xff]  ;;  %55 = vperm.xlu1 %532, %v51_v1   ;;  %v38_v4 = vld [vmem:[%s731_s3 + $0x8] sm:$0xff]  ;;  %v207_v10 = vld [vmem:[%s732_s5 + $0x10] sm:$0xff] }
   0x3   :  { %41 = vperm.xlu0 %531, %v37_v2   ;;  %v206_v5 = vld [vmem:[%s732_s5 + $0x8] sm:$0xff]  ;;  %v205_v6 = vld [vmem:[%s732_s5] sm:$0xff]  ;;  %v212_v11 = vld [vmem:[%s733_s6 + $0x18] sm:$0xff] }
   0x4   :  { %v210_v7 = vld [vmem:[%s733_s6 + $0x8] sm:$0xff]  ;;  %v209_v8 = vld [vmem:[%s733_s6] sm:$0xff]  ;;  %v211_v12 = vld [vmem:[%s733_s6 + $0x10] sm:$0xff] }
   0x5   :  { %v67_v13 = vld [vmem:[%s734_s7] sm:$0xff]  ;;  %v36_v18 = vld [vmem:[%s735_s0 + $0x8] sm:$0xff]  ;;  %v69_v43 = vld [vmem:[%s734_s7 + $0x10] sm:$0xff] }
   0x6   :  { %60 = vperm.xlu1 %532, %v52_v3   ;;  %479 = vmatprep.mubr.msk.f32.mxu0 %vm75_vm0, %v67_v13  ;;  %v35_v14 = vld [vmem:[%s735_s0] sm:$0xff]  ;;  %v214_v32 = vld [vmem:[%s736_s1 + $0x8] sm:$0xff]  ;;  %v70_v50 = vld [vmem:[%s734_s7 + $0x18] sm:$0xff] }
   0x7   :  { %46 = vperm.xlu0 %531, %v38_v4   ;;  %v495_v28 = vpack.c.bf16 %v36_v18, %v35_v14  ;;  %v268_v34 = vld [vmem:[%s737_s2 + $0x8] sm:$0xff]  ;;  %v213_v36 = vld [vmem:[%s736_s1] sm:$0xff] }
   0x8   :  { %v267_v37 = vld [vmem:[%s737_s2] sm:$0xff]  ;;  %v68_v38 = vld [vmem:[%s734_s7 + $0x8] sm:$0xff] }
   0x9   :  { %v324_v59 = vld [vmem:[%s738_s9 + $0x8] sm:$0xff] }
   0xa   :  { %222 = vperm.xlu1 %532, %v206_v5  }
   0xb   :  { %217 = vperm.xlu0 %531, %v205_v6  }
   0xe   :  { %246 = vperm.xlu1 %532, %v210_v7  }
   0xf   :  { %241 = vperm.xlu0 %531, %v209_v8  }
  0x12   :  { %232 = vperm.xlu1 %532, %v208_v9  }
  0x13   :  { %227 = vperm.xlu0 %531, %v207_v10  }
  0x16   :  { %256 = vperm.xlu1 %532, %v212_v11  }
  0x17   :  { %251 = vperm.xlu0 %531, %v211_v12  }
  0x81   :  { %v56_v15 = vpop.permute.xlu1 %55 }
  0x82   :  { %v42_v16 = vpop.permute.xlu0 %41 }
  0x83   :  { %v49_v17 = vmul.f32 %v42_v16, %v35_v14  ;;  %v323_v16 = vld [vmem:[%s738_s9] sm:$0xff] }
  0x85   :  { %v61_v19 = vpop.permute.xlu1 %60  ;;  %v63_v21 = vadd.f32 %v56_v15, %v49_v17  ;;  %v71_v17 = vld [vmem:[%s734_s7 + $0x20] sm:$0xff] }
  0x86   :  { %v47_v20 = vpop.permute.xlu0 %46 }
  0x87   :  { %v50_v22 = vmul.f32 %v47_v20, %v36_v18  ;;  %v65_v26 = vmax.f32 %v63_v21, 0.0  ;;  %v72_v18 = vld [vmem:[%s734_s7 + $0x28] sm:$0xff]  ;;  %v73_v20 = vld [vmem:[%s734_s7 + $0x30] sm:$0xff]  ;;  %v74_v21 = vld [vmem:[%s734_s7 + $0x38] sm:$0xff] }
  0x89   :  { %v64_v23 = vadd.f32 %v61_v19, %v50_v22  ;;  %v223_v24 = vpop.permute.xlu1 %222  ;;  %v556_v19 = vmov 0.0   ;;  %v281_v22 = vlaneseq }
  0x8a   :  { %v218_v25 = vpop.permute.xlu0 %217  ;;  %406 = vmatprep.mubr.f32.mxu1 %v556_v19 }
  0x8b   :  { %v66_v27 = vmax.f32 %v64_v23, 0.0  ;;  %v282_v23 = vand.u32 127, %v281_v22 }
  0x8d   :  { %v491_v29 = vpack.c.bf16 %v66_v27, %v65_v26  ;;  %v247_v30 = vpop.permute.xlu1 %246 }
  0x8e   :  { %v242_v31 = vpop.permute.xlu0 %241 }
  0x8f   :  { %492 = vmatprep.subr.bf16.mxu0 %v491_v29 }
  0x90   :  { %494 = vmatpush3.bf16.msra.mxu0 %v491_v29 }
  0x91   :  { %496 = vmatprep.subr.bf16.mxu0 %v495_v28  ;;  %v233_v33 = vpop.permute.xlu1 %232 }
  0x92   :  { %v228_v35 = vpop.permute.xlu0 %227  ;;  %v238_v39 = vmul.f32 %v233_v33, %v214_v32  ;;  %v272_v40 = vmul.f32 %v268_v34, %v233_v33 }
  0x93   :  { %v237_v41 = vmul.f32 %v228_v35, %v213_v36  ;;  %v271_v42 = vmul.f32 %v267_v37, %v228_v35 }
  0x94   :  { %498 = vmatpush3.bf16.msra.mxu0 %v495_v28 }
  0x95   :  { %v257_v44 = vpop.permute.xlu1 %256 }
  0x96   :  { %v252_v45 = vpop.permute.xlu0 %251  ;;  %v262_v46 = vadd.f32 %v257_v44, %v238_v39  ;;  %v276_v47 = vadd.f32 %v272_v40, %v257_v44 }
  0x97   :  { %v261_v48 = vadd.f32 %v252_v45, %v237_v41  ;;  %v275_v49 = vadd.f32 %v271_v42, %v252_v45  ;;  %480 = vmatmul.mubr.msk.f32.vlgmr.msra.gmra.mrb[0].mxu0 %vm75_vm0, %v68_v38  ;;  %v321_v41 = vld [vmem:[%s739_s8] sm:$0xff]  ;;  %v322_v42 = vld [vmem:[%s739_s8 + $0x8] sm:$0xff] }
  0x98   :  { %482 = vmatprep.mubr.msk.f32.mxu0 %vm75_vm0, %v69_v43  ;;  %v266_v51 = vmax.f32 %v262_v46, 0.0  ;;  %v280_v52 = vmax.f32 %v276_v47, 0.0 }
  0x99   :  { %v265_v53 = vmax.f32 %v261_v48, 0.0  ;;  %v279_v54 = vmax.f32 %v275_v49, 0.0 }
  0x9b   :  { %483 = vmatmul.mubr.msk.f32.gmra.mrb[2].mxu0 %vm75_vm0, %v70_v50  ;;  %v538_v55 = vpack.i.bf16 %v280_v52, %v279_v54  ;;  %v682_v56 = vpack.c.bf16 %v266_v51, %v265_v53  ;;  %v684_v57 = vpack.c.bf16 %v280_v52, %v279_v54  ;;  %v548_v58 = vpack.i.bf16 %v266_v51, %v265_v53 }
  0x9c   :  { %485 = vmatprep.mubr.msk.f32.mxu0 %vm75_vm0, %v71_v17 }
  0x9d   :  { %539 = vrot.lane.b32.xlu1 %v538_v55, %s554_s28 }
  0x9f   :  { %486 = vmatmul.mubr.msk.f32.gmra.mrb[4].mxu0 %vm75_vm0, %v72_v18 }
  0xa0   :  { %488 = vmatprep.mubr.msk.f32.mxu0 %vm75_vm0, %v73_v20 }
  0xa1   :  { %549 = vrot.lane.b32.xlu1 %v548_v58, %s555_s29 }
  0xa3   :  { %489 = vmatmul.mubr.msk.f32.gmra.mrb[6].mxu0 %vm75_vm0, %v74_v21 }
  0xa5   :  { %332 = vperm.xlu1 %532, %v324_v59  }
 0x16a   :  { %v481_v60 = vpop.f32.mrb[0].mxu0 }
 0x16b   :  { %v236_v61 = vmul.f32 %v481_v60, %v223_v24  ;;  %v166_v62 = vpop.f32.mrb[1].mxu0 }
 0x16c   :  { %v235_v63 = vmul.f32 %v218_v25, %v166_v62 }
 0x16d   :  { %v260_v0 = vadd.f32 %v247_v30, %v236_v61 }
 0x16e   :  { %v259_v1 = vadd.f32 %v242_v31, %v235_v63  ;;  %v484_v2 = vpop.f32.mrb[2].mxu0 }
 0x16f   :  { %v264_v3 = vmax.f32 %v260_v0, 0.0  ;;  %v270_v4 = vmul.f32 %v484_v2, %v223_v24  ;;  %v176_v5 = vpop.f32.mrb[3].mxu0  ;;  %v287_v24 = vand.u32 63, %v282_v23 }
 0x170   :  { %v263_v6 = vmax.f32 %v259_v1, 0.0  ;;  %v269_v7 = vmul.f32 %v218_v25, %v176_v5  ;;  %v540_v25 = vpop.permute.xlu1 %539 }
 0x171   :  { %v274_v8 = vadd.f32 %v270_v4, %v247_v30  ;;  %vm457_vm1 = vcmp.ne.s32.totalorder %v287_v24, 0  ;;  %v542_v29 = vunpack.i.h.bf16 %v540_v25  ;;  %v541_v30 = vunpack.i.l.bf16 %v540_v25 }
 0x172   :  { %v273_v9 = vadd.f32 %v269_v7, %v242_v31  ;;  %v499_v10 = vpack.c.bf16 %v264_v3, %v263_v6  ;;  %v543_v11 = vpack.i.bf16 %v264_v3, %v263_v6  ;;  %vm502_vm2 = vmpackc.low %vm457_vm1, %vm457_vm1  ;;  %vm458_vm3 = vcmp.ne.s32.totalorder %v287_v24, 63  ;;  %v487_v43 = vpop.f32.mrb[4].mxu0 }
 0x173   :  { %v278_v12 = vmax.f32 %v274_v8, 0.0  ;;  %v506_v32 = vpack.c.bf16 %v542_v29, %v541_v30  ;;  %vm518_vm4 = vmpackc.low %vm458_vm3, %vm458_vm3  ;;  %v186_v44 = vpop.f32.mrb[5].mxu0 }
 0x174   :  { %v277_v13 = vmax.f32 %v273_v9, 0.0  ;;  %500 = vmatprep.subr.bf16.mxu1 %v499_v10  ;;  %v550_v36 = vpop.permute.xlu1 %549 }
 0x175   :  { %v552_v37 = vunpack.i.h.bf16 %v550_v36  ;;  %v551_v38 = vunpack.i.l.bf16 %v550_v36 }
 0x176   :  { %v533_v14 = vpack.i.bf16 %v278_v12, %v277_v13  ;;  %v509_v15 = vpack.c.bf16 %v278_v12, %v277_v13  ;;  %v490_v45 = vpop.f32.mrb[6].mxu0 }
 0x177   :  { %v522_v40 = vpack.c.bf16 %v552_v37, %v551_v38  ;;  %v196_v46 = vpop.f32.mrb[7].mxu0 }
 0x178   :  { %534 = vrot.lane.b32.xlu0 %v533_v14, %s554_s28  ;;  %v333_v53 = vpop.permute.xlu1 %332 }
 0x17c   :  { %544 = vrot.lane.b32.xlu0 %v543_v11, %s555_s29 }
 0x180   :  { %327 = vperm.xlu0 %531, %v323_v16  }
 0x1ea   :  { %v535_v26 = vpop.permute.xlu0 %534 }
 0x1eb   :  { %v537_v27 = vunpack.i.h.bf16 %v535_v26  ;;  %v536_v28 = vunpack.i.l.bf16 %v535_v26 }
 0x1ed   :  { %v501_v31 = vpack.c.bf16 %v537_v27, %v536_v28 }
 0x1ee   :  { %v545_v33 = vpop.permute.xlu0 %544 }
 0x1ef   :  { %503 = vmatpush1.bf16.msk.msra.mxu1 %vm502_vm2, %v501_v31  ;;  %v547_v34 = vunpack.i.h.bf16 %v545_v33  ;;  %v546_v35 = vunpack.i.l.bf16 %v545_v33 }
 0x1f0   :  { %505 = vmatprep.subr.bf16.mxu1 %v682_v56 }
 0x1f1   :  { %v517_v39 = vpack.c.bf16 %v547_v34, %v546_v35 }
 0x1f3   :  { %508 = vmatpush1.bf16.msk.msra.mxu1 %vm502_vm2, %v506_v32 }
 0x1f4   :  { %510 = vmatprep.subr.bf16.mxu1 %v509_v15 }
 0x1f7   :  { %512 = vmatpush1.bf16.msra.mxu1 %v499_v10 }
 0x1f8   :  { %514 = vmatprep.subr.bf16.mxu1 %v684_v57 }
 0x1fb   :  { %516 = vmatpush1.bf16.msra.mxu1 %v682_v56 }
 0x1fc   :  { %519 = vmatprep.subr.msk.bf16.mxu1 %vm518_vm4, %v517_v39 }
 0x1ff   :  { %521 = vmatpush1.bf16.msra.mxu1 %v509_v15  ;;  %v328_v47 = vpop.permute.xlu0 %327 }
 0x200   :  { %524 = vmatprep.subr.msk.bf16.mxu1 %vm518_vm4, %v522_v40 }
 0x203   :  { %526 = vmatpush1.bf16.msra.mxu1 %v684_v57 }
 0x206   :  { %455 = vmatmul.mubr.msk.f32.vlgmr.msra.gmra.mrb[0].mxu1 %vm335_vm5, %v321_v41 }
 0x207   :  { %412 = vmatprep.mubr.f32.mxu1 %v556_v19 }
 0x20a   :  { %456 = vmatmul.mubr.msk.f32.gmra.mrb[2].mxu1 %vm335_vm5, %v322_v42 }
 0x2d9   :  { %v408_v48 = vpop.f32.mrb[0].mxu1 }
 0x2da   :  { %v409_v49 = vadd.f32 %v408_v48, %v328_v47  ;;  %v410_v50 = vpop.f32.mrb[1].mxu1 }
 0x2db   :  { %v411_v51 = vadd.f32 %v410_v50, %v328_v47 }
 0x2dc   :  { %v419_v52 = vadd.f32 %v409_v49, %v186_v44 }
 0x2dd   :  { %v420_v54 = vadd.f32 %v411_v51, %v196_v46  ;;  %v414_v55 = vpop.f32.mrb[2].mxu1 }
 0x2de   :  { %423 = vst [vmem:[%s740_s10] sm:$0xff] %v419_v52  ;;  %v415_v56 = vadd.f32 %v414_v55, %v333_v53  ;;  %v416_v57 = vpop.f32.mrb[3].mxu1 }
 0x2df   :  { %424 = vst [vmem:[%s740_s10 + $0x8] sm:$0xff] %v420_v54  ;;  %v417_v58 = vadd.f32 %v416_v57, %v333_v53 }
 0x2e0   :  { %v421_v59 = vadd.f32 %v487_v43, %v415_v56 }
 0x2e1   :  { %v422_v60 = vadd.f32 %v490_v45, %v417_v58 }
 0x2e2   :  { %425 = vst [vmem:[%s740_s10 + $0x10] sm:$0xff] %v421_v59 }
 0x2e3   :  { %426 = vst [vmem:[%s740_s10 + $0x18] sm:$0xff] %v422_v60 }

</bundles_post_ra>
